<compile_context>
chip_gen: v7x
topology: tpu7x:2x2x1
jax: 0.10.0
libtpu: 0.0.40
codegen_flags: <defaults>
</compile_context>

<pallas_src>
import functools

import numpy as np
import jax
import jax.numpy as jnp
from jax.experimental import pallas as pl
from jax.experimental.pallas import tpu as pltpu

# Static irreps spec as (mul, dim) pairs, e.g. "4x0e + 2x1o + 3x2e"
IRREPS = ((4, 1), (2, 3), (3, 5))  # in_dim = 4+6+15 = 25, out_dim = 1+3+5 = 9


def _round_up(x, m):
    return ((x + m - 1) // m) * m


@functools.lru_cache(maxsize=None)
def _build_average_matrix(irreps):
    """Constant (in_dim, out_dim) f32 matrix A with A[ix+m*d+j, oix+j] = 1/mul."""
    in_dim = sum(mul * d for mul, d in irreps)
    out_dim = sum(d for _, d in irreps)
    A = np.zeros((in_dim, out_dim), dtype=np.float32)
    ix = 0
    oix = 0
    for mul, d in irreps:
        inv = 1.0 / float(mul)
        for m in range(mul):
            for j in range(d):
                A[ix + m * d + j, oix + j] = inv
        ix += mul * d
        oix += d
    return A


def _average_matmul_kernel(x_ref, a_ref, o_ref):
    # One MXU matmul per tile: (tn, C_in) @ (C_in, out_dim) -> (tn, out_dim).
    # A stays f32; accumulate in f32 regardless of input dtype.
    o_ref[...] = jnp.dot(
        x_ref[...].astype(jnp.float32), a_ref[...],
        preferred_element_type=jnp.float32,
    ).astype(o_ref.dtype)


@functools.partial(jax.jit, static_argnames=("irreps", "tile_n"))
def _average_pallas(x, irreps, tile_n):
    N, C = x.shape
    out_dim = sum(d for _, d in irreps)
    # A is built once per irreps (lru_cache) and baked as a jit constant.
    A = jnp.asarray(_build_average_matrix(irreps))

    # Sublane alignment matching the dtype's packing (8 f32 / 16 bf16 / 32 int8).
    sub = {4: 8, 2: 16, 1: 32}.get(jnp.dtype(x.dtype).itemsize, 8)

    # Cap the tile so the parallel grid axis has >= 4 steps (v7x megacore
    # sharding + pipeline overlap), while large tiles amortize step overhead.
    tn = min(_round_up(tile_n, sub), _round_up(max(pl.cdiv(N, 4), 1), sub))
    tn = max(tn, sub)
    grid = (pl.cdiv(N, tn),)

    return pl.pallas_call(
        _average_matmul_kernel,
        out_shape=jax.ShapeDtypeStruct((N, out_dim), x.dtype),
        grid=grid,
        in_specs=[
            # x tile: last dim equals the full feature dim (legal even if <128)
            pl.BlockSpec((tn, C), lambda i: (i, 0)),
            # averaging matrix: resident in VMEM across all grid steps
            pl.BlockSpec((C, out_dim), lambda i: (0, 0)),
        ],
        # Unpadded output block: last dim equals the full array dim.
        out_specs=pl.BlockSpec((tn, out_dim), lambda i: (i, 0)),
        compiler_params=pltpu.CompilerParams(
            dimension_semantics=("parallel",),
            vmem_limit_bytes=32 * 1024 * 1024,
        ),
    )(x, A)


@functools.partial(jax.jit, static_argnames=("irreps",))
def _average_xla(x, irreps):
    # Small-N fallback: plain XLA, fuses with neighboring ops.
    outs = []
    ix = 0
    for mul, d in irreps:
        field = x[:, ix:ix + mul * d].reshape(-1, mul, d)
        outs.append(field.mean(axis=1))
        ix += mul * d
    return jnp.concatenate(outs, axis=-1)


def average_forward(x, irreps=IRREPS, tile_n=8192, min_pallas_rows=1024):
    """Forward for `average`. x: (N, sum(mul*d)) -> (N, sum(d))."""
    irreps = tuple((int(m), int(d)) for m, d in irreps)
    N, C = x.shape
    in_dim = sum(m * d for m, d in irreps)
    assert C == in_dim, f"feature dim {C} != irreps dim {in_dim}"
    if N < min_pallas_rows:
        return _average_xla(x, irreps)
    return _average_pallas(x, irreps, int(tile_n))


def average_reference(x, irreps):
    # Pure-numpy/JAX reference mirroring the PyTorch forward (independent path).
    outs = []
    ix = 0
    for mul, d in irreps:
        field = x[:, ix:ix + mul * d].reshape(-1, mul, d)
        outs.append(field.mean(axis=1))
        ix += mul * d
    return jnp.concatenate(outs, axis=-1)


if __name__ == "__main__":
    key = jax.random.PRNGKey(0)
    in_dim = sum(mul * d for mul, d in IRREPS)    # 25
    out_dim = sum(d for _, d in IRREPS)           # 9

    # 1) Pallas path: N above the fallback threshold -> grid of 4 row tiles.
    N_big = 2048
    k1, k2 = jax.random.split(key)
    x_big = jax.random.normal(k1, (N_big, in_dim), dtype=jnp.float32)
    out_big = jax.block_until_ready(average_forward(x_big, IRREPS))
    ref_big = average_reference(x_big, IRREPS)
    assert out_big.shape == (N_big, out_dim)
    assert jnp.allclose(out_big, ref_big, atol=1e-5, rtol=1e-5), "pallas mismatch"

    # 2) Small-N fallback path (pure XLA) for tiny graphs.
    N_small = 8
    x_small = jax.random.normal(k2, (N_small, in_dim), dtype=jnp.float32)
    out_small = jax.block_until_ready(average_forward(x_small, IRREPS))
    ref_small = average_reference(x_small, IRREPS)
    assert out_small.shape == (N_small, out_dim)
    assert jnp.allclose(out_small, ref_small, atol=1e-5, rtol=1e-5), "fallback mismatch"

    print("KERNEL_OK")
</pallas_src>

<mosaic_0001>
module attributes {stable_mosaic.version = 11 : i64} {
  func.func @_average_matmul_kernel(%arg0: i32, %arg1: memref<512x25xf32, #tpu.memory_space<vmem>>, %arg2: memref<25x9xf32, #tpu.memory_space<vmem>>, %arg3: memref<512x9xf32, #tpu.memory_space<vmem>>) attributes {dimension_semantics = [#tpu.dimension_semantics<parallel>], iteration_bounds = array<i64: 4>, scalar_prefetch = 0 : i64, scratch_operands = 0 : i64, tpu.core_type = #tpu.core_type<tc>, window_params = [{transform_indices = @transform_0, window_bounds = array<i64: 512, 25>}, {pipeline_mode = #tpu.pipeline_mode<synchronous>, transform_indices = @transform_1, window_bounds = array<i64: 25, 9>}, {transform_indices = @transform_2, window_bounds = array<i64: 512, 9>}]} {
    %c0 = arith.constant 0 : index
    %c0_0 = arith.constant 0 : index
    %0 = vector.load %arg1[%c0, %c0_0] : memref<512x25xf32, #tpu.memory_space<vmem>>, vector<512x25xf32>
    %c0_1 = arith.constant 0 : index
    %c0_2 = arith.constant 0 : index
    %1 = vector.load %arg2[%c0_1, %c0_2] : memref<25x9xf32, #tpu.memory_space<vmem>>, vector<25x9xf32>
    %cst = arith.constant dense<0.000000e+00> : vector<512x9xf32>
    %2 = tpu.matmul %0, %1, %cst {dimension_numbers = #tpu.dot_dimension_numbers<[1], [0], [0], [1], [0, 0, 1, 1], [], []>} : vector<512x25xf32>, vector<25x9xf32>, vector<512x9xf32> -> vector<512x9xf32>
    %c0_3 = arith.constant 0 : index
    %c0_4 = arith.constant 0 : index
    %3 = vector.load %arg3[%c0_3, %c0_4] : memref<512x9xf32, #tpu.memory_space<vmem>>, vector<512x9xf32>
    tpu.vector_store %arg3[%c0_3, %c0_4], %2 {strides = array<i32>} : memref<512x9xf32, #tpu.memory_space<vmem>>, vector<512x9xf32>,
    return
  }
  func.func @transform_0(%arg0: i32) -> (i32, i32) {
    %c0_i32 = arith.constant 0 : i32
    %c0_i32_0 = arith.constant 0 : i32
    return %arg0, %c0_i32 : i32, i32
  }
  func.func @transform_1(%arg0: i32) -> (i32, i32) {
    %c0_i32 = arith.constant 0 : i32
    %c0_i32_0 = arith.constant 0 : i32
    %c0_i32_1 = arith.constant 0 : i32
    return %c0_i32, %c0_i32_0 : i32, i32
  }
  func.func @transform_2(%arg0: i32) -> (i32, i32) {
    %c0_i32 = arith.constant 0 : i32
    %c0_i32_0 = arith.constant 0 : i32
    return %arg0, %c0_i32 : i32, i32
  }
}

</mosaic_0001>

<bundles_post_ra>
// kernel: _average_pallas.1
= control target key start
LH: loop header
LB: loop body
LE: loop exit
PB: predicated region body
PF: predicated region fallthrough
CT: control target
= control target key end

     0   :  { %s1213_s9 = smov 0   ;;  %s1509_s0 = inlined_call_operand.vmem [shape: f32[2048,25], index: 0, kind: input, shape index: {}]   ;;  %s1510_s1 = inlined_call_operand.vmem [shape: f32[25,9], index: 1, kind: input, shape index: {}]   ;;  %s1511_s2 = inlined_call_operand.vmem [shape: f32[2048,9], index: 2, kind: output, shape index: {}]  }
   0x1 LB: > { %s918_s10 = sadd.s32 4294967295, %s1195_s9   ;;  %p922_p0 = scmp.ge.s32.totalorder %s1195_s9, 1  ;;  %s1195_s9 = sphi %s1213_s9, %s12_s9  }
   0x2   : > { %p113_p1 = scmp.lt.s32.totalorder %s1195_s9, 5 }
   0x4   : > { %p114_p2 = pnand %p922_p0, %p113_p1 }
   0x5   : > { %v211_v0 = vld [vmem:[%s1510_s1] sm:$0xff] (!%p114_p2)  ;;  %v212_v1 = vld [vmem:[%s1510_s1 + $0x8] sm:$0xff] (!%p114_p2)  ;;  %v213_v2 = vld [vmem:[%s1510_s1 + $0x10] sm:$0xff] (!%p114_p2)  ;;  %vm408_vm0 = vcmask (!%p114_p2), 1040384   ;;  %s923_s17 = sshll.u32 (!%p114_p2), %s918_s10, 6  ;;  %vm1197_vm1 = vmmov (!%p114_p2), 1  }
   0x6   : > { %117 = sbr.rel (%p114_p2) target bundleno = 293 (0x125), region = 28  ;;  %v1166_v3 = vpack.c.bf16 (!%p114_p2), %v212_v1, %v211_v0  ;;  %v214_v4 = vld [vmem:[%s1510_s1 + $0x18] sm:$0x1] (!%p114_p2)  ;;  %p136_p3 = scmp.lt.s32.totalorder (!%p114_p2), %s923_s17, 255  ;;  %vm1171_vm2 = vmpackc.low (!%p114_p2), %vm408_vm0, %vm1197_vm1  ;;  %vm215_vm3 = vcmask (!%p114_p2), 203776   ;;  %vm797_vm4 = vcmask (!%p114_p2), 72704  }
   0x7   : > { %v1170_v5 = vpack.c.bf16 (!%p114_p2), %v214_v4, %v213_v2 }
   0x8   : > { %1167 = vmatprep.subr.bf16.mxu0 (!%p114_p2), %v1166_v3  ;;  %1176 = vmatprep.subr.bf16.mxu1 (!%p114_p2), %v1166_v3 }
   0x9   : > { %1169 = vmatpush3.bf16.msra.mxu0 (!%p114_p2), %v1166_v3  ;;  %1178 = vmatpush3.bf16.msra.mxu1 (!%p114_p2), %v1166_v3 }
   0xa   : > { %1172 = vmatprep.subr.msk.bf16.mxu0 (!%p114_p2), %vm1171_vm2, %v1170_v5  ;;  %1177 = vmatprep.subr.msk.bf16.mxu1 (!%p114_p2), %vm1171_vm2, %v1170_v5 }
   0xd   : > { %s1513_s17 = smov (!%p136_p3, %s923_s17), 255  ;;  %1175 = vmatpush3.bf16.msk.msra.mxu0 %vm1171_vm2, %v1170_v5  ;;  %1179 = vmatpush3.bf16.msk.msra.mxu1 %vm1171_vm2, %v1170_v5 }
   0xe   : > { %s924_s20 = sshll.u32 %s1513_s17, 3 }
   0xf   : > { %s1241_s23 = scalar_lea.vmem %s1509_s0, %s924_s20  ;;  %s1376_s26 = scalar_lea.vmem %s1511_s2, %s924_s20 }
  0x10   : > { %v147_v6 = vld [vmem:[%s1241_s23] sm:$0xff]  ;;  %v148_v8 = vld [vmem:[%s1241_s23 + $0x8] sm:$0xff]  ;;  %v149_v10 = vld [vmem:[%s1241_s23 + $0x10] sm:$0xff] }
  0x11   : > { %v179_v7 = vld [vmem:[%s1241_s23 + $0x100] sm:$0xff]  ;;  %v180_v9 = vld [vmem:[%s1241_s23 + $0x108] sm:$0xff]  ;;  %1070 = vmatprep.mubr.msk.f32.mxu0 %vm215_vm3, %v147_v6  ;;  %v181_v11 = vld [vmem:[%s1241_s23 + $0x110] sm:$0xff] }
  0x12   : > { %1118 = vmatprep.mubr.msk.f32.mxu1 %vm215_vm3, %v179_v7  ;;  %1071 = vmatmul.mubr.msk.f32.vlgmr.msra.gmra.mrb[0].mxu0 %vm215_vm3, %v148_v8  ;;  %v150_v12 = vld [vmem:[%s1241_s23 + $0x18] sm:$0xff]  ;;  %v151_v14 = vld [vmem:[%s1241_s23 + $0x20] sm:$0xff]  ;;  %v152_v16 = vld [vmem:[%s1241_s23 + $0x28] sm:$0xff] }
  0x13   : > { %1119 = vmatmul.mubr.msk.f32.vlgmr.msra.gmra.mrb[0].mxu1 %vm215_vm3, %v180_v9  ;;  %1073 = vmatprep.mubr.msk.f32.mxu0 %vm215_vm3, %v149_v10  ;;  %v182_v13 = vld [vmem:[%s1241_s23 + $0x118] sm:$0xff]  ;;  %v183_v15 = vld [vmem:[%s1241_s23 + $0x120] sm:$0xff]  ;;  %v184_v17 = vld [vmem:[%s1241_s23 + $0x128] sm:$0xff] }
  0x14   : > { %1121 = vmatprep.mubr.msk.f32.mxu1 %vm215_vm3, %v181_v11  ;;  %v153_v18 = vld [vmem:[%s1241_s23 + $0x30] sm:$0xff]  ;;  %v154_v20 = vld [vmem:[%s1241_s23 + $0x38] sm:$0xff]  ;;  %v155_v22 = vld [vmem:[%s1241_s23 + $0x40] sm:$0xff] }
  0x15   : > { %v185_v19 = vld [vmem:[%s1241_s23 + $0x130] sm:$0xff]  ;;  %v186_v21 = vld [vmem:[%s1241_s23 + $0x138] sm:$0xff]  ;;  %v187_v23 = vld [vmem:[%s1241_s23 + $0x140] sm:$0xff] }
  0x16   : > { %1074 = vmatmul.mubr.msk.f32.gmra.mrb[2].mxu0 %vm215_vm3, %v150_v12  ;;  %v156_v24 = vld [vmem:[%s1241_s23 + $0x48] sm:$0xff]  ;;  %v157_v26 = vld [vmem:[%s1241_s23 + $0x50] sm:$0xff]  ;;  %v158_v28 = vld [vmem:[%s1241_s23 + $0x58] sm:$0xff] }
  0x17   : > { %1122 = vmatmul.mubr.msk.f32.gmra.mrb[2].mxu1 %vm215_vm3, %v182_v13  ;;  %1076 = vmatprep.mubr.msk.f32.mxu0 %vm215_vm3, %v151_v14  ;;  %v188_v25 = vld [vmem:[%s1241_s23 + $0x148] sm:$0xff]  ;;  %v189_v27 = vld [vmem:[%s1241_s23 + $0x150] sm:$0xff]  ;;  %v190_v29 = vld [vmem:[%s1241_s23 + $0x158] sm:$0xff] }
  0x18   : > { %1124 = vmatprep.mubr.msk.f32.mxu1 %vm215_vm3, %v183_v15  ;;  %v159_v30 = vld [vmem:[%s1241_s23 + $0x60] sm:$0xff]  ;;  %v160_v32 = vld [vmem:[%s1241_s23 + $0x68] sm:$0xff]  ;;  %v161_v34 = vld [vmem:[%s1241_s23 + $0x70] sm:$0xff] }
  0x19   : > { %v191_v31 = vld [vmem:[%s1241_s23 + $0x160] sm:$0xff]  ;;  %v192_v33 = vld [vmem:[%s1241_s23 + $0x168] sm:$0xff]  ;;  %v193_v35 = vld [vmem:[%s1241_s23 + $0x170] sm:$0xff] }
  0x1a   : > { %1077 = vmatmul.mubr.msk.f32.gmra.mrb[4].mxu0 %vm215_vm3, %v152_v16  ;;  %v162_v36 = vld [vmem:[%s1241_s23 + $0x78] sm:$0xff]  ;;  %v163_v38 = vld [vmem:[%s1241_s23 + $0x80] sm:$0xff]  ;;  %v164_v40 = vld [vmem:[%s1241_s23 + $0x88] sm:$0xff] }
  0x1b   : > { %1125 = vmatmul.mubr.msk.f32.gmra.mrb[4].mxu1 %vm215_vm3, %v184_v17  ;;  %1079 = vmatprep.mubr.msk.f32.mxu0 %vm215_vm3, %v153_v18  ;;  %v194_v37 = vld [vmem:[%s1241_s23 + $0x178] sm:$0xff]  ;;  %v195_v39 = vld [vmem:[%s1241_s23 + $0x180] sm:$0xff]  ;;  %v196_v41 = vld [vmem:[%s1241_s23 + $0x188] sm:$0xff] }
  0x1c   : > { %1127 = vmatprep.mubr.msk.f32.mxu1 %vm215_vm3, %v185_v19  ;;  %v165_v42 = vld [vmem:[%s1241_s23 + $0x90] sm:$0xff]  ;;  %v166_v44 = vld [vmem:[%s1241_s23 + $0x98] sm:$0xff]  ;;  %v167_v46 = vld [vmem:[%s1241_s23 + $0xa0] sm:$0xff] }
  0x1d   : > { %v197_v43 = vld [vmem:[%s1241_s23 + $0x190] sm:$0xff]  ;;  %v198_v45 = vld [vmem:[%s1241_s23 + $0x198] sm:$0xff]  ;;  %v199_v47 = vld [vmem:[%s1241_s23 + $0x1a0] sm:$0xff] }
  0x1e   : > { %1080 = vmatmul.mubr.msk.f32.gmra.mrb[6].mxu0 %vm215_vm3, %v154_v20  ;;  %v168_v48 = vld [vmem:[%s1241_s23 + $0xa8] sm:$0xff]  ;;  %v169_v50 = vld [vmem:[%s1241_s23 + $0xb0] sm:$0xff]  ;;  %v170_v52 = vld [vmem:[%s1241_s23 + $0xb8] sm:$0xff] }
  0x1f   : > { %1128 = vmatmul.mubr.msk.f32.gmra.mrb[6].mxu1 %vm215_vm3, %v186_v21  ;;  %1082 = vmatprep.mubr.msk.f32.mxu0 %vm215_vm3, %v155_v22  ;;  %v200_v49 = vld [vmem:[%s1241_s23 + $0x1a8] sm:$0xff]  ;;  %v201_v51 = vld [vmem:[%s1241_s23 + $0x1b0] sm:$0xff]  ;;  %v202_v53 = vld [vmem:[%s1241_s23 + $0x1b8] sm:$0xff] }
  0x20   : > { %1130 = vmatprep.mubr.msk.f32.mxu1 %vm215_vm3, %v187_v23  ;;  %v171_v54 = vld [vmem:[%s1241_s23 + $0xc0] sm:$0xff]  ;;  %v172_v56 = vld [vmem:[%s1241_s23 + $0xc8] sm:$0xff]  ;;  %v173_v58 = vld [vmem:[%s1241_s23 + $0xd0] sm:$0xff] }
  0x21   : > { %v203_v55 = vld [vmem:[%s1241_s23 + $0x1c0] sm:$0xff]  ;;  %v204_v57 = vld [vmem:[%s1241_s23 + $0x1c8] sm:$0xff]  ;;  %v205_v59 = vld [vmem:[%s1241_s23 + $0x1d0] sm:$0xff] }
  0x22   : > { %1083 = vmatmul.mubr.msk.f32.gmra.mrb[8].mxu0 %vm215_vm3, %v156_v24  ;;  %v174_v60 = vld [vmem:[%s1241_s23 + $0xd8] sm:$0xff]  ;;  %v175_v62 = vld [vmem:[%s1241_s23 + $0xe0] sm:$0xff]  ;;  %v176_v0 = vld [vmem:[%s1241_s23 + $0xe8] sm:$0xff] }
  0x23   : > { %1131 = vmatmul.mubr.msk.f32.gmra.mrb[8].mxu1 %vm215_vm3, %v188_v25  ;;  %1085 = vmatprep.mubr.msk.f32.mxu0 %vm215_vm3, %v157_v26  ;;  %v206_v61 = vld [vmem:[%s1241_s23 + $0x1d8] sm:$0xff]  ;;  %v207_v63 = vld [vmem:[%s1241_s23 + $0x1e0] sm:$0xff]  ;;  %v208_v1 = vld [vmem:[%s1241_s23 + $0x1e8] sm:$0xff] }
  0x24   : > { %1133 = vmatprep.mubr.msk.f32.mxu1 %vm215_vm3, %v189_v27  ;;  %v177_v2 = vld [vmem:[%s1241_s23 + $0xf0] sm:$0xff]  ;;  %v178_v4 = vld [vmem:[%s1241_s23 + $0xf8] sm:$0xff] }
  0x25   : > { %v209_v3 = vld [vmem:[%s1241_s23 + $0x1f0] sm:$0xff]  ;;  %v210_v5 = vld [vmem:[%s1241_s23 + $0x1f8] sm:$0xff] }
  0x26   : > { %1086 = vmatmul.mubr.msk.f32.gmra.mrb[10].mxu0 %vm215_vm3, %v158_v28 }
  0x27   : > { %1134 = vmatmul.mubr.msk.f32.gmra.mrb[10].mxu1 %vm215_vm3, %v190_v29  ;;  %1088 = vmatprep.mubr.msk.f32.mxu0 %vm215_vm3, %v159_v30 }
  0x28   : > { %1136 = vmatprep.mubr.msk.f32.mxu1 %vm215_vm3, %v191_v31 }
  0x2a   : > { %1089 = vmatmul.mubr.msk.f32.gmra.mrb[12].mxu0 %vm215_vm3, %v160_v32 }
  0x2b   : > { %1137 = vmatmul.mubr.msk.f32.gmra.mrb[12].mxu1 %vm215_vm3, %v192_v33  ;;  %1091 = vmatprep.mubr.msk.f32.mxu0 %vm215_vm3, %v161_v34 }
  0x2c   : > { %1139 = vmatprep.mubr.msk.f32.mxu1 %vm215_vm3, %v193_v35 }
  0x2e   : > { %1092 = vmatmul.mubr.msk.f32.gmra.mrb[14].mxu0 %vm215_vm3, %v162_v36 }
  0x2f   : > { %1140 = vmatmul.mubr.msk.f32.gmra.mrb[14].mxu1 %vm215_vm3, %v194_v37  ;;  %1094 = vmatprep.mubr.msk.f32.mxu0 %vm215_vm3, %v163_v38 }
  0x30   : > { %1142 = vmatprep.mubr.msk.f32.mxu1 %vm215_vm3, %v195_v39 }
  0x32   : > { %1095 = vmatmul.mubr.msk.f32.gmra.mrb[16].mxu0 %vm215_vm3, %v164_v40 }
  0x33   : > { %1143 = vmatmul.mubr.msk.f32.gmra.mrb[16].mxu1 %vm215_vm3, %v196_v41  ;;  %1097 = vmatprep.mubr.msk.f32.mxu0 %vm215_vm3, %v165_v42 }
  0x34   : > { %1145 = vmatprep.mubr.msk.f32.mxu1 %vm215_vm3, %v197_v43 }
  0x36   : > { %1098 = vmatmul.mubr.msk.f32.gmra.mrb[18].mxu0 %vm215_vm3, %v166_v44 }
  0x37   : > { %1146 = vmatmul.mubr.msk.f32.gmra.mrb[18].mxu1 %vm215_vm3, %v198_v45  ;;  %1100 = vmatprep.mubr.msk.f32.mxu0 %vm215_vm3, %v167_v46 }
  0x38   : > { %1148 = vmatprep.mubr.msk.f32.mxu1 %vm215_vm3, %v199_v47 }
  0x3a   : > { %1101 = vmatmul.mubr.msk.f32.gmra.mrb[20].mxu0 %vm215_vm3, %v168_v48 }
  0x3b   : > { %1149 = vmatmul.mubr.msk.f32.gmra.mrb[20].mxu1 %vm215_vm3, %v200_v49  ;;  %1103 = vmatprep.mubr.msk.f32.mxu0 %vm215_vm3, %v169_v50 }
  0x3c   : > { %1151 = vmatprep.mubr.msk.f32.mxu1 %vm215_vm3, %v201_v51 }
  0x3e   : > { %1104 = vmatmul.mubr.msk.f32.gmra.mrb[22].mxu0 %vm215_vm3, %v170_v52 }
  0x3f   : > { %1152 = vmatmul.mubr.msk.f32.gmra.mrb[22].mxu1 %vm215_vm3, %v202_v53  ;;  %1106 = vmatprep.mubr.msk.f32.mxu0 %vm215_vm3, %v171_v54 }
  0x40   : > { %1154 = vmatprep.mubr.msk.f32.mxu1 %vm215_vm3, %v203_v55 }
  0x42   : > { %1107 = vmatmul.mubr.msk.f32.gmra.mrb[24].mxu0 %vm215_vm3, %v172_v56 }
  0x43   : > { %1155 = vmatmul.mubr.msk.f32.gmra.mrb[24].mxu1 %vm215_vm3, %v204_v57  ;;  %1109 = vmatprep.mubr.msk.f32.mxu0 %vm215_vm3, %v173_v58 }
  0x44   : > { %1157 = vmatprep.mubr.msk.f32.mxu1 %vm215_vm3, %v205_v59 }
  0x46   : > { %1110 = vmatmul.mubr.msk.f32.gmra.mrb[26].mxu0 %vm215_vm3, %v174_v60 }
  0x47   : > { %1158 = vmatmul.mubr.msk.f32.gmra.mrb[26].mxu1 %vm215_vm3, %v206_v61  ;;  %1112 = vmatprep.mubr.msk.f32.mxu0 %vm215_vm3, %v175_v62 }
  0x48   : > { %1160 = vmatprep.mubr.msk.f32.mxu1 %vm215_vm3, %v207_v63 }
  0x4a   : > { %1113 = vmatmul.mubr.msk.f32.gmra.mrb[28].mxu0 %vm215_vm3, %v176_v0 }
  0x4b   : > { %1161 = vmatmul.mubr.msk.f32.gmra.mrb[28].mxu1 %vm215_vm3, %v208_v1  ;;  %1115 = vmatprep.mubr.msk.f32.mxu0 %vm215_vm3, %v177_v2 }
  0x4c   : > { %1163 = vmatprep.mubr.msk.f32.mxu1 %vm215_vm3, %v209_v3 }
  0x4e   : > { %1116 = vmatmul.mubr.msk.f32.gmra.mrb[30].mxu0 %vm215_vm3, %v178_v4 }
  0x4f   : > { %1164 = vmatmul.mubr.msk.f32.gmra.mrb[30].mxu1 %vm215_vm3, %v210_v5 }
  0xe5   : > { %v1072_v6 = vpop.f32.mrb[0].mxu0 }
  0xe6   : > { %v1120_v7 = vpop.f32.mrb[0].mxu1  ;;  %799 = vst.msk [vmem:[%s1376_s26 + $0x8] sm:$0xff] %vm797_vm4, %v1072_v6  ;;  %v478_v8 = vpop.f32.mrb[1].mxu0 }
  0xe7   : > { %831 = vst.msk [vmem:[%s1376_s26 + $0x108] sm:$0xff] %vm797_vm4, %v1120_v7  ;;  %v638_v9 = vpop.f32.mrb[1].mxu1  ;;  %798 = vst.msk [vmem:[%s1376_s26] sm:$0xff] %vm797_vm4, %v478_v8 }
  0xe8   : > { %830 = vst.msk [vmem:[%s1376_s26 + $0x100] sm:$0xff] %vm797_vm4, %v638_v9 }
  0xe9   : > { %v1075_v10 = vpop.f32.mrb[2].mxu0 }
  0xea   : > { %v1123_v11 = vpop.f32.mrb[2].mxu1  ;;  %801 = vst.msk [vmem:[%s1376_s26 + $0x18] sm:$0xff] %vm797_vm4, %v1075_v10  ;;  %v488_v12 = vpop.f32.mrb[3].mxu0 }
  0xeb   : > { %833 = vst.msk [vmem:[%s1376_s26 + $0x118] sm:$0xff] %vm797_vm4, %v1123_v11  ;;  %v648_v13 = vpop.f32.mrb[3].mxu1  ;;  %800 = vst.msk [vmem:[%s1376_s26 + $0x10] sm:$0xff] %vm797_vm4, %v488_v12 }
  0xec   : > { %832 = vst.msk [vmem:[%s1376_s26 + $0x110] sm:$0xff] %vm797_vm4, %v648_v13 }
  0xed   : > { %v1078_v14 = vpop.f32.mrb[4].mxu0 }
  0xee   : > { %v1126_v15 = vpop.f32.mrb[4].mxu1  ;;  %803 = vst.msk [vmem:[%s1376_s26 + $0x28] sm:$0xff] %vm797_vm4, %v1078_v14  ;;  %v498_v16 = vpop.f32.mrb[5].mxu0 }
  0xef   : > { %835 = vst.msk [vmem:[%s1376_s26 + $0x128] sm:$0xff] %vm797_vm4, %v1126_v15  ;;  %v658_v17 = vpop.f32.mrb[5].mxu1  ;;  %802 = vst.msk [vmem:[%s1376_s26 + $0x20] sm:$0xff] %vm797_vm4, %v498_v16 }
  0xf0   : > { %834 = vst.msk [vmem:[%s1376_s26 + $0x120] sm:$0xff] %vm797_vm4, %v658_v17 }
  0xf1   : > { %v1081_v18 = vpop.f32.mrb[6].mxu0 }
  0xf2   : > { %v1129_v19 = vpop.f32.mrb[6].mxu1  ;;  %805 = vst.msk [vmem:[%s1376_s26 + $0x38] sm:$0xff] %vm797_vm4, %v1081_v18  ;;  %v508_v20 = vpop.f32.mrb[7].mxu0 }
  0xf3   : > { %837 = vst.msk [vmem:[%s1376_s26 + $0x138] sm:$0xff] %vm797_vm4, %v1129_v19  ;;  %v668_v21 = vpop.f32.mrb[7].mxu1  ;;  %804 = vst.msk [vmem:[%s1376_s26 + $0x30] sm:$0xff] %vm797_vm4, %v508_v20 }
  0xf4   : > { %836 = vst.msk [vmem:[%s1376_s26 + $0x130] sm:$0xff] %vm797_vm4, %v668_v21 }
  0xf5   : > { %v1084_v22 = vpop.f32.mrb[8].mxu0 }
  0xf6   : > { %v1132_v23 = vpop.f32.mrb[8].mxu1  ;;  %807 = vst.msk [vmem:[%s1376_s26 + $0x48] sm:$0xff] %vm797_vm4, %v1084_v22  ;;  %v518_v24 = vpop.f32.mrb[9].mxu0 }
  0xf7   : > { %839 = vst.msk [vmem:[%s1376_s26 + $0x148] sm:$0xff] %vm797_vm4, %v1132_v23  ;;  %v678_v25 = vpop.f32.mrb[9].mxu1  ;;  %806 = vst.msk [vmem:[%s1376_s26 + $0x40] sm:$0xff] %vm797_vm4, %v518_v24 }
  0xf8   : > { %838 = vst.msk [vmem:[%s1376_s26 + $0x140] sm:$0xff] %vm797_vm4, %v678_v25 }
  0xf9   : > { %v1087_v26 = vpop.f32.mrb[10].mxu0 }
  0xfa   : > { %v1135_v27 = vpop.f32.mrb[10].mxu1  ;;  %809 = vst.msk [vmem:[%s1376_s26 + $0x58] sm:$0xff] %vm797_vm4, %v1087_v26  ;;  %v528_v28 = vpop.f32.mrb[11].mxu0 }
  0xfb   : > { %841 = vst.msk [vmem:[%s1376_s26 + $0x158] sm:$0xff] %vm797_vm4, %v1135_v27  ;;  %v688_v29 = vpop.f32.mrb[11].mxu1  ;;  %808 = vst.msk [vmem:[%s1376_s26 + $0x50] sm:$0xff] %vm797_vm4, %v528_v28 }
  0xfc   : > { %840 = vst.msk [vmem:[%s1376_s26 + $0x150] sm:$0xff] %vm797_vm4, %v688_v29 }
  0xfd   : > { %v1090_v30 = vpop.f32.mrb[12].mxu0 }
  0xfe   : > { %v1138_v31 = vpop.f32.mrb[12].mxu1  ;;  %811 = vst.msk [vmem:[%s1376_s26 + $0x68] sm:$0xff] %vm797_vm4, %v1090_v30  ;;  %v538_v32 = vpop.f32.mrb[13].mxu0 }
  0xff   : > { %843 = vst.msk [vmem:[%s1376_s26 + $0x168] sm:$0xff] %vm797_vm4, %v1138_v31  ;;  %v698_v33 = vpop.f32.mrb[13].mxu1  ;;  %810 = vst.msk [vmem:[%s1376_s26 + $0x60] sm:$0xff] %vm797_vm4, %v538_v32 }
 0x100   : > { %842 = vst.msk [vmem:[%s1376_s26 + $0x160] sm:$0xff] %vm797_vm4, %v698_v33 }
 0x101   : > { %v1093_v34 = vpop.f32.mrb[14].mxu0 }
 0x102   : > { %v1141_v35 = vpop.f32.mrb[14].mxu1  ;;  %813 = vst.msk [vmem:[%s1376_s26 + $0x78] sm:$0xff] %vm797_vm4, %v1093_v34  ;;  %v548_v36 = vpop.f32.mrb[15].mxu0 }
 0x103   : > { %845 = vst.msk [vmem:[%s1376_s26 + $0x178] sm:$0xff] %vm797_vm4, %v1141_v35  ;;  %v708_v37 = vpop.f32.mrb[15].mxu1  ;;  %812 = vst.msk [vmem:[%s1376_s26 + $0x70] sm:$0xff] %vm797_vm4, %v548_v36 }
 0x104   : > { %844 = vst.msk [vmem:[%s1376_s26 + $0x170] sm:$0xff] %vm797_vm4, %v708_v37 }
 0x105   : > { %v1096_v38 = vpop.f32.mrb[16].mxu0 }
 0x106   : > { %v1144_v39 = vpop.f32.mrb[16].mxu1  ;;  %815 = vst.msk [vmem:[%s1376_s26 + $0x88] sm:$0xff] %vm797_vm4, %v1096_v38  ;;  %v558_v40 = vpop.f32.mrb[17].mxu0 }
 0x107   : > { %847 = vst.msk [vmem:[%s1376_s26 + $0x188] sm:$0xff] %vm797_vm4, %v1144_v39  ;;  %v718_v41 = vpop.f32.mrb[17].mxu1  ;;  %814 = vst.msk [vmem:[%s1376_s26 + $0x80] sm:$0xff] %vm797_vm4, %v558_v40 }
 0x108   : > { %846 = vst.msk [vmem:[%s1376_s26 + $0x180] sm:$0xff] %vm797_vm4, %v718_v41 }
 0x109   : > { %v1099_v42 = vpop.f32.mrb[18].mxu0 }
 0x10a   : > { %v1147_v43 = vpop.f32.mrb[18].mxu1  ;;  %817 = vst.msk [vmem:[%s1376_s26 + $0x98] sm:$0xff] %vm797_vm4, %v1099_v42  ;;  %v568_v44 = vpop.f32.mrb[19].mxu0 }
 0x10b   : > { %849 = vst.msk [vmem:[%s1376_s26 + $0x198] sm:$0xff] %vm797_vm4, %v1147_v43  ;;  %v728_v45 = vpop.f32.mrb[19].mxu1  ;;  %816 = vst.msk [vmem:[%s1376_s26 + $0x90] sm:$0xff] %vm797_vm4, %v568_v44 }
 0x10c   : > { %848 = vst.msk [vmem:[%s1376_s26 + $0x190] sm:$0xff] %vm797_vm4, %v728_v45 }
 0x10d   : > { %v1102_v46 = vpop.f32.mrb[20].mxu0 }
 0x10e   : > { %v1150_v47 = vpop.f32.mrb[20].mxu1  ;;  %819 = vst.msk [vmem:[%s1376_s26 + $0xa8] sm:$0xff] %vm797_vm4, %v1102_v46  ;;  %v578_v48 = vpop.f32.mrb[21].mxu0 }
 0x10f   : > { %851 = vst.msk [vmem:[%s1376_s26 + $0x1a8] sm:$0xff] %vm797_vm4, %v1150_v47  ;;  %v738_v49 = vpop.f32.mrb[21].mxu1  ;;  %818 = vst.msk [vmem:[%s1376_s26 + $0xa0] sm:$0xff] %vm797_vm4, %v578_v48 }
 0x110   : > { %850 = vst.msk [vmem:[%s1376_s26 + $0x1a0] sm:$0xff] %vm797_vm4, %v738_v49 }
 0x111   : > { %v1105_v50 = vpop.f32.mrb[22].mxu0 }
 0x112   : > { %v1153_v51 = vpop.f32.mrb[22].mxu1  ;;  %821 = vst.msk [vmem:[%s1376_s26 + $0xb8] sm:$0xff] %vm797_vm4, %v1105_v50  ;;  %v588_v52 = vpop.f32.mrb[23].mxu0 }
 0x113   : > { %853 = vst.msk [vmem:[%s1376_s26 + $0x1b8] sm:$0xff] %vm797_vm4, %v1153_v51  ;;  %v748_v53 = vpop.f32.mrb[23].mxu1  ;;  %820 = vst.msk [vmem:[%s1376_s26 + $0xb0] sm:$0xff] %vm797_vm4, %v588_v52 }
 0x114   : > { %852 = vst.msk [vmem:[%s1376_s26 + $0x1b0] sm:$0xff] %vm797_vm4, %v748_v53 }
 0x115   : > { %v1108_v54 = vpop.f32.mrb[24].mxu0 }
 0x116   : > { %v1156_v55 = vpop.f32.mrb[24].mxu1  ;;  %823 = vst.msk [vmem:[%s1376_s26 + $0xc8] sm:$0xff] %vm797_vm4, %v1108_v54  ;;  %v598_v56 = vpop.f32.mrb[25].mxu0 }
 0x117   : > { %855 = vst.msk [vmem:[%s1376_s26 + $0x1c8] sm:$0xff] %vm797_vm4, %v1156_v55  ;;  %v758_v57 = vpop.f32.mrb[25].mxu1  ;;  %822 = vst.msk [vmem:[%s1376_s26 + $0xc0] sm:$0xff] %vm797_vm4, %v598_v56 }
 0x118   : > { %854 = vst.msk [vmem:[%s1376_s26 + $0x1c0] sm:$0xff] %vm797_vm4, %v758_v57 }
 0x119   : > { %v1111_v58 = vpop.f32.mrb[26].mxu0 }
 0x11a   : > { %v1159_v59 = vpop.f32.mrb[26].mxu1  ;;  %825 = vst.msk [vmem:[%s1376_s26 + $0xd8] sm:$0xff] %vm797_vm4, %v1111_v58  ;;  %v608_v60 = vpop.f32.mrb[27].mxu0 }
 0x11b   : > { %857 = vst.msk [vmem:[%s1376_s26 + $0x1d8] sm:$0xff] %vm797_vm4, %v1159_v59  ;;  %v768_v61 = vpop.f32.mrb[27].mxu1  ;;  %824 = vst.msk [vmem:[%s1376_s26 + $0xd0] sm:$0xff] %vm797_vm4, %v608_v60 }
 0x11c   : > { %856 = vst.msk [vmem:[%s1376_s26 + $0x1d0] sm:$0xff] %vm797_vm4, %v768_v61 }
 0x11d   : > { %v1114_v62 = vpop.f32.mrb[28].mxu0 }
 0x11e   : > { %v1162_v63 = vpop.f32.mrb[28].mxu1  ;;  %827 = vst.msk [vmem:[%s1376_s26 + $0xe8] sm:$0xff] %vm797_vm4, %v1114_v62  ;;  %v618_v0 = vpop.f32.mrb[29].mxu0 }
 0x11f   : > { %859 = vst.msk [vmem:[%s1376_s26 + $0x1e8] sm:$0xff] %vm797_vm4, %v1162_v63  ;;  %v778_v1 = vpop.f32.mrb[29].mxu1  ;;  %826 = vst.msk [vmem:[%s1376_s26 + $0xe0] sm:$0xff] %vm797_vm4, %v618_v0 }
 0x120   : > { %858 = vst.msk [vmem:[%s1376_s26 + $0x1e0] sm:$0xff] %vm797_vm4, %v778_v1 }
 0x121   : > { %v1117_v2 = vpop.f32.mrb[30].mxu0 }
 0x122   : > { %v1165_v3 = vpop.f32.mrb[30].mxu1  ;;  %829 = vst.msk [vmem:[%s1376_s26 + $0xf8] sm:$0xff] %vm797_vm4, %v1117_v2  ;;  %v628_v4 = vpop.f32.mrb[31].mxu0 }
 0x123   : > { %861 = vst.msk [vmem:[%s1376_s26 + $0x1f8] sm:$0xff] %vm797_vm4, %v1165_v3  ;;  %v788_v5 = vpop.f32.mrb[31].mxu1  ;;  %828 = vst.msk [vmem:[%s1376_s26 + $0xf0] sm:$0xff] %vm797_vm4, %v628_v4 }
 0x124   : > { %860 = vst.msk [vmem:[%s1376_s26 + $0x1f0] sm:$0xff] %vm797_vm4, %v788_v5 }
 0x125 PF: > { %s12_s9 = sadd.s32 1, %s1195_s9  }
 0x126   : > { %p9_p4 = scmp.ge.s32.totalorder %s12_s9, 6  }
 0x128   :  { %11 = sbr.rel (!%p9_p4) target bundleno = 1 (0x1), region = 58 }

</bundles_post_ra>
